<compile_context>
chip_gen: v5e
topology: v5e:2x2
jax: 0.10.0
libtpu: 0.0.40
codegen_flags: <defaults>
</compile_context>

<pallas_src>
import functools

import jax
import jax.numpy as jnp
from jax import lax
from jax.experimental import pallas as pl
from jax.experimental.pallas import tpu as pltpu


def senior_block_kernel(x_ref, w1_ref, w2_ref, wf_ref, b1_ref, b2_ref, bf_ref,
                        out_ref, *, H, W):
    """One image per grid step. All tensors are (channels, H*W) lane-dense."""
    HW = H * W
    P = w1_ref.shape[0]                         # planes (conv1/conv2 width)

    x = x_ref[...]                              # (Cin, HW) f32

    # ---- conv1 (1x1, BN folded into weights) + relu ------------------------
    out1 = jnp.dot(w1_ref[...], x, preferred_element_type=jnp.float32)
    out1 = jnp.maximum(out1 + b1_ref[...], 0.0)                 # (P, HW)

    # ---- conv2 (3x3, pad=1, BN folded) + relu as ONE K=9*P matmul ----------
    # Tap (dy,dx): value at pixel p=(y,x) is out1 at (y+dy, x+dx), zero outside
    # the image.  Each tap = lane rotation (pltpu.roll, jnp.roll semantics) of
    # out1 by -(dy*W+dx), masked where the source pixel falls off the image.
    # Masks are (1, HW) and broadcast along the sublane (channel) axis.
    pix = lax.broadcasted_iota(jnp.int32, (1, HW), 1)           # flat index
    if W & (W - 1) == 0:
        col = pix & (W - 1)                                     # x coordinate
    else:
        col = pix % W
    row_ok = {-1: pix >= W, 0: None, 1: pix < (H - 1) * W}
    col_ok = {-1: col >= 1, 0: None, 1: col < (W - 1)}

    taps = []
    for dy in (-1, 0, 1):
        for dx in (-1, 0, 1):
            delta = dy * W + dx
            if delta == 0:
                t = out1
            else:
                t = pltpu.roll(out1, shift=(-delta) % HW, axis=1)
            m = row_ok[dy]
            if col_ok[dx] is not None:
                m = col_ok[dx] if m is None else (m & col_ok[dx])
            if m is not None:
                t = jnp.where(m, t, 0.0)
            taps.append(t)
    tap_mat = jnp.concatenate(taps, axis=0)                     # (9*P, HW)
    out2 = jnp.dot(w2_ref[...], tap_mat, preferred_element_type=jnp.float32)
    out2 = jnp.maximum(out2 + b2_ref[...], 0.0)                 # (P, HW)

    # ---- conv3 (1x1) + downsample (1x1) fused into one matmul + relu -------
    cat = jnp.concatenate([out2, x], axis=0)                    # (P+Cin, HW)
    out3 = jnp.dot(wf_ref[...], cat, preferred_element_type=jnp.float32)
    out_ref[...] = jnp.maximum(out3 + bf_ref[...], 0.0)         # (Cout, HW)


def senior_block_pallas(x_nchw, w1_k, w2_k, wf_k, b1_k, b2_k, bf_k):
    N, Cin, H, W = x_nchw.shape
    P = w1_k.shape[0]
    Cout = wf_k.shape[0]
    HW = H * W
    x_flat = x_nchw.reshape(N, Cin, HW)           # NCHW already lane-dense

    flops = 2 * N * HW * (Cin * P + 9 * P * P + (P + Cin) * Cout)
    bytes_accessed = 4 * (x_flat.size + N * Cout * HW + w1_k.size + w2_k.size
                          + wf_k.size + b1_k.size + b2_k.size + bf_k.size)

    out = pl.pallas_call(
        functools.partial(senior_block_kernel, H=H, W=W),
        out_shape=jax.ShapeDtypeStruct((N, Cout, HW), jnp.float32),
        grid_spec=pltpu.PrefetchScalarGridSpec(
            num_scalar_prefetch=0,
            grid=(N,),
            in_specs=[
                pl.BlockSpec((None, Cin, HW), lambda b: (b, 0, 0)),
                pl.BlockSpec((P, Cin), lambda b: (0, 0)),
                pl.BlockSpec((P, 9 * P), lambda b: (0, 0)),
                pl.BlockSpec((Cout, P + Cin), lambda b: (0, 0)),
                pl.BlockSpec((P, 1), lambda b: (0, 0)),
                pl.BlockSpec((P, 1), lambda b: (0, 0)),
                pl.BlockSpec((Cout, 1), lambda b: (0, 0)),
            ],
            out_specs=pl.BlockSpec((None, Cout, HW), lambda b: (b, 0, 0)),
        ),
        compiler_params=pltpu.CompilerParams(
            dimension_semantics=("parallel",)),   # batch sharded across cores
        cost_estimate=pl.CostEstimate(
            flops=flops, transcendentals=0, bytes_accessed=bytes_accessed),
    )(x_flat, w1_k, w2_k, wf_k, b1_k, b2_k, bf_k)
    return out.reshape(N, Cout, H, W)


# --------------------------- parameter setup --------------------------------

def fold_bn(gamma, beta, mean, var, eps=1e-5):
    s = gamma / jnp.sqrt(var + eps)
    return s, beta - mean * s


def make_params(key, in_planes, planes, expansion=4):
    out_planes = planes * expansion
    ks = jax.random.split(key, 20)

    def conv_w(k, out_c, in_c, kh, kw):
        bound = 1.0 / (in_c * kh * kw) ** 0.5
        return jax.random.uniform(k, (out_c, in_c, kh, kw), jnp.float32,
                                  -bound, bound)

    def bn_p(kg, kb, km, kv, c):
        gamma = jax.random.uniform(kg, (c,), jnp.float32, 0.5, 1.5)
        beta = jax.random.uniform(kb, (c,), jnp.float32, -0.5, 0.5)
        mean = jax.random.uniform(km, (c,), jnp.float32, -0.5, 0.5)
        var = jax.random.uniform(kv, (c,), jnp.float32, 0.5, 1.5)
        return gamma, beta, mean, var

    return {
        "w1": conv_w(ks[0], planes, in_planes, 1, 1),
        "w2": conv_w(ks[1], planes, planes, 3, 3),
        "w3": conv_w(ks[2], out_planes, planes, 1, 1),
        "wd": conv_w(ks[3], out_planes, in_planes, 1, 1),
        "bn1": bn_p(ks[4], ks[5], ks[6], ks[7], planes),
        "bn2": bn_p(ks[8], ks[9], ks[10], ks[11], planes),
        "bn3": bn_p(ks[12], ks[13], ks[14], ks[15], out_planes),
        "bnd": bn_p(ks[16], ks[17], ks[18], ks[19], out_planes),
    }


def prepare_kernel_params(p):
    """Fold BN scales into weights, fuse conv3 + downsample, build bias columns."""
    planes = p["w1"].shape[0]
    s1, b1 = fold_bn(*p["bn1"])
    s2, b2 = fold_bn(*p["bn2"])
    s3, b3 = fold_bn(*p["bn3"])
    sd, bd = fold_bn(*p["bnd"])

    w1_k = p["w1"][:, :, 0, 0] * s1[:, None]                          # (P, Cin)
    # (O,I,kh,kw) -> (O,kh,kw,I) -> (O, 9*I); column = (kh*3+kw)*I + i matches
    # the kernel's tap order (dy,dx) = (kh-1, kw-1) and tap_mat row layout.
    w2_k = (jnp.transpose(p["w2"], (0, 2, 3, 1)).reshape(planes, 9 * planes)
            * s2[:, None])                                            # (P, 9P)
    w3_s = p["w3"][:, :, 0, 0] * s3[:, None]                          # (Cout, P)
    wd_s = p["wd"][:, :, 0, 0] * sd[:, None]                          # (Cout, Cin)
    wf_k = jnp.concatenate([w3_s, wd_s], axis=1)                      # (Cout, P+Cin)

    return w1_k, w2_k, wf_k, b1[:, None], b2[:, None], (b3 + bd)[:, None]


# ------------------------ pure-JAX reference (NCHW) --------------------------

def reference(x_nchw, p):
    def conv(x, w, stride=1, padding=0):
        return lax.conv_general_dilated(
            x, w, (stride, stride),
            ((padding, padding), (padding, padding)),
            dimension_numbers=("NCHW", "OIHW", "NCHW"))

    def bn(x, params):
        g, b, m, v = params
        s = g / jnp.sqrt(v + 1e-5)
        bb = b - m * s
        return x * s[None, :, None, None] + bb[None, :, None, None]

    out = jax.nn.relu(bn(conv(x_nchw, p["w1"]), p["bn1"]))
    out = jax.nn.relu(bn(conv(out, p["w2"], padding=1), p["bn2"]))
    out = bn(conv(out, p["w3"]), p["bn3"])
    res = bn(conv(x_nchw, p["wd"]), p["bnd"])          # downsample branch
    return jax.nn.relu(out + res)


if __name__ == "__main__":
    # Senior_Block(in_planes=4, planes=8, stride=1) with a 1x1-conv+bn
    # downsample (in_planes != planes * expansion); output channels = 32.
    # TODO(synk): stride > 1 and downsample=None (identity residual) variants
    # are not specialized in the kernel; this instantiation uses stride=1.
    N, Cin, H, W = 2, 4, 16, 16
    planes = 8
    Cout = planes * 4

    key = jax.random.PRNGKey(0)
    kx, kp = jax.random.split(key)
    x = jax.random.normal(kx, (N, Cin, H, W), jnp.float32)
    p = make_params(kp, Cin, planes)

    w1_k, w2_k, wf_k, b1_k, b2_k, bf_k = prepare_kernel_params(p)

    out = senior_block_pallas(x, w1_k, w2_k, wf_k, b1_k, b2_k, bf_k)
    out = jax.block_until_ready(out)

    ref = reference(x, p)
    assert out.shape == ref.shape == (N, Cout, H, W)
    max_err = float(jnp.max(jnp.abs(out - ref)))
    assert jnp.allclose(out, ref, atol=1e-3, rtol=1e-3), max_err

    print("KERNEL_OK")
</pallas_src>

<mosaic_0001>
module attributes {stable_mosaic.version = 11 : i64} {
  func.func @senior_block_kernel(%arg0: i32, %arg1: memref<1x4x256xf32, #tpu.memory_space<vmem>>, %arg2: memref<8x4xf32, #tpu.memory_space<vmem>>, %arg3: memref<8x72xf32, #tpu.memory_space<vmem>>, %arg4: memref<32x12xf32, #tpu.memory_space<vmem>>, %arg5: memref<8x1xf32, #tpu.memory_space<vmem>>, %arg6: memref<8x1xf32, #tpu.memory_space<vmem>>, %arg7: memref<32x1xf32, #tpu.memory_space<vmem>>, %arg8: memref<1x32x256xf32, #tpu.memory_space<vmem>>) attributes {dimension_semantics = [#tpu.dimension_semantics<parallel>], iteration_bounds = array<i64: 2>, scalar_prefetch = 0 : i64, scratch_operands = 0 : i64, tpu.core_type = #tpu.core_type<tc>, window_params = [{transform_indices = @transform_0, window_bounds = array<i64: 1, 4, 256>}, {pipeline_mode = #tpu.pipeline_mode<synchronous>, transform_indices = @transform_1, window_bounds = array<i64: 8, 4>}, {pipeline_mode = #tpu.pipeline_mode<synchronous>, transform_indices = @transform_2, window_bounds = array<i64: 8, 72>}, {pipeline_mode = #tpu.pipeline_mode<synchronous>, transform_indices = @transform_3, window_bounds = array<i64: 32, 12>}, {pipeline_mode = #tpu.pipeline_mode<synchronous>, transform_indices = @transform_4, window_bounds = array<i64: 8, 1>}, {pipeline_mode = #tpu.pipeline_mode<synchronous>, transform_indices = @transform_5, window_bounds = array<i64: 8, 1>}, {pipeline_mode = #tpu.pipeline_mode<synchronous>, transform_indices = @transform_6, window_bounds = array<i64: 32, 1>}, {transform_indices = @transform_7, window_bounds = array<i64: 1, 32, 256>}]} {
    %c0 = arith.constant 0 : index
    %c0_0 = arith.constant 0 : index
    %c0_1 = arith.constant 0 : index
    %0 = vector.load %arg1[%c0, %c0_0, %c0_1] : memref<1x4x256xf32, #tpu.memory_space<vmem>>, vector<1x4x256xf32>
    %1 = vector.shape_cast %0 : vector<1x4x256xf32> to vector<4x256xf32>
    %c0_2 = arith.constant 0 : index
    %c0_3 = arith.constant 0 : index
    %2 = vector.load %arg2[%c0_2, %c0_3] : memref<8x4xf32, #tpu.memory_space<vmem>>, vector<8x4xf32>
    %cst = arith.constant dense<0.000000e+00> : vector<8x256xf32>
    %3 = tpu.matmul %2, %1, %cst {dimension_numbers = #tpu.dot_dimension_numbers<[1], [0], [0], [1], [0, 0, 1, 1], [], []>} : vector<8x4xf32>, vector<4x256xf32>, vector<8x256xf32> -> vector<8x256xf32>
    %c0_4 = arith.constant 0 : index
    %c0_5 = arith.constant 0 : index
    %4 = vector.load %arg5[%c0_4, %c0_5] : memref<8x1xf32, #tpu.memory_space<vmem>>, vector<8x1xf32>
    %5 = vector.broadcast %4 : vector<8x1xf32> to vector<8x256xf32>
    %6 = arith.addf %3, %5 : vector<8x256xf32>
    %cst_6 = arith.constant 0.000000e+00 : f32
    %7 = vector.broadcast %cst_6 : f32 to vector<8x256xf32>
    %8 = arith.maximumf %6, %7 : vector<8x256xf32>
    %9 = tpu.iota {dimensions = array<i32: 1>} : vector<1x256xi32>
    %c15_i32 = arith.constant 15 : i32
    %10 = vector.broadcast %c15_i32 : i32 to vector<1x256xi32>
    %11 = arith.andi %9, %10 : vector<1x256xi32>
    %c16_i32 = arith.constant 16 : i32
    %12 = vector.broadcast %c16_i32 : i32 to vector<1x256xi32>
    %13 = arith.cmpi sge, %9, %12 : vector<1x256xi32>
    %c240_i32 = arith.constant 240 : i32
    %14 = vector.broadcast %c240_i32 : i32 to vector<1x256xi32>
    %15 = arith.cmpi slt, %9, %14 : vector<1x256xi32>
    %c1_i32 = arith.constant 1 : i32
    %16 = vector.broadcast %c1_i32 : i32 to vector<1x256xi32>
    %17 = arith.cmpi sge, %11, %16 : vector<1x256xi32>
    %c15_i32_7 = arith.constant 15 : i32
    %18 = vector.broadcast %c15_i32_7 : i32 to vector<1x256xi32>
    %19 = arith.cmpi slt, %11, %18 : vector<1x256xi32>
    %c17_i32 = arith.constant 17 : i32
    %20 = tpu.dynamic_rotate %8 by %c17_i32 dim 1 : vector<8x256xf32>, i32 -> vector<8x256xf32>
    %21 = arith.andi %13, %17 : vector<1x256xi1>
    %cst_8 = arith.constant 0.000000e+00 : f32
    %22 = vector.shape_cast %21 : vector<1x256xi1> to vector<1x256xi1>
    %23 = vector.broadcast %22 : vector<1x256xi1> to vector<8x256xi1>
    %24 = vector.broadcast %cst_8 : f32 to vector<8x256xf32>
    %25 = arith.select %23, %20, %24 : vector<8x256xi1>, vector<8x256xf32>
    %c16_i32_9 = arith.constant 16 : i32
    %26 = tpu.dynamic_rotate %8 by %c16_i32_9 dim 1 : vector<8x256xf32>, i32 -> vector<8x256xf32>
    %cst_10 = arith.constant 0.000000e+00 : f32
    %27 = vector.shape_cast %13 : vector<1x256xi1> to vector<1x256xi1>
    %28 = vector.broadcast %27 : vector<1x256xi1> to vector<8x256xi1>
    %29 = vector.broadcast %cst_10 : f32 to vector<8x256xf32>
    %30 = arith.select %28, %26, %29 : vector<8x256xi1>, vector<8x256xf32>
    %c15_i32_11 = arith.constant 15 : i32
    %31 = tpu.dynamic_rotate %8 by %c15_i32_11 dim 1 : vector<8x256xf32>, i32 -> vector<8x256xf32>
    %32 = arith.andi %13, %19 : vector<1x256xi1>
    %cst_12 = arith.constant 0.000000e+00 : f32
    %33 = vector.shape_cast %32 : vector<1x256xi1> to vector<1x256xi1>
    %34 = vector.broadcast %33 : vector<1x256xi1> to vector<8x256xi1>
    %35 = vector.broadcast %cst_12 : f32 to vector<8x256xf32>
    %36 = arith.select %34, %31, %35 : vector<8x256xi1>, vector<8x256xf32>
    %c1_i32_13 = arith.constant 1 : i32
    %37 = tpu.dynamic_rotate %8 by %c1_i32_13 dim 1 : vector<8x256xf32>, i32 -> vector<8x256xf32>
    %cst_14 = arith.constant 0.000000e+00 : f32
    %38 = vector.shape_cast %17 : vector<1x256xi1> to vector<1x256xi1>
    %39 = vector.broadcast %38 : vector<1x256xi1> to vector<8x256xi1>
    %40 = vector.broadcast %cst_14 : f32 to vector<8x256xf32>
    %41 = arith.select %39, %37, %40 : vector<8x256xi1>, vector<8x256xf32>
    %c255_i32 = arith.constant 255 : i32
    %42 = tpu.dynamic_rotate %8 by %c255_i32 dim 1 : vector<8x256xf32>, i32 -> vector<8x256xf32>
    %cst_15 = arith.constant 0.000000e+00 : f32
    %43 = vector.shape_cast %19 : vector<1x256xi1> to vector<1x256xi1>
    %44 = vector.broadcast %43 : vector<1x256xi1> to vector<8x256xi1>
    %45 = vector.broadcast %cst_15 : f32 to vector<8x256xf32>
    %46 = arith.select %44, %42, %45 : vector<8x256xi1>, vector<8x256xf32>
    %c241_i32 = arith.constant 241 : i32
    %47 = tpu.dynamic_rotate %8 by %c241_i32 dim 1 : vector<8x256xf32>, i32 -> vector<8x256xf32>
    %48 = arith.andi %15, %17 : vector<1x256xi1>
    %cst_16 = arith.constant 0.000000e+00 : f32
    %49 = vector.shape_cast %48 : vector<1x256xi1> to vector<1x256xi1>
    %50 = vector.broadcast %49 : vector<1x256xi1> to vector<8x256xi1>
    %51 = vector.broadcast %cst_16 : f32 to vector<8x256xf32>
    %52 = arith.select %50, %47, %51 : vector<8x256xi1>, vector<8x256xf32>
    %c240_i32_17 = arith.constant 240 : i32
    %53 = tpu.dynamic_rotate %8 by %c240_i32_17 dim 1 : vector<8x256xf32>, i32 -> vector<8x256xf32>
    %cst_18 = arith.constant 0.000000e+00 : f32
    %54 = vector.shape_cast %15 : vector<1x256xi1> to vector<1x256xi1>
    %55 = vector.broadcast %54 : vector<1x256xi1> to vector<8x256xi1>
    %56 = vector.broadcast %cst_18 : f32 to vector<8x256xf32>
    %57 = arith.select %55, %53, %56 : vector<8x256xi1>, vector<8x256xf32>
    %c239_i32 = arith.constant 239 : i32
    %58 = tpu.dynamic_rotate %8 by %c239_i32 dim 1 : vector<8x256xf32>, i32 -> vector<8x256xf32>
    %59 = arith.andi %15, %19 : vector<1x256xi1>
    %cst_19 = arith.constant 0.000000e+00 : f32
    %60 = vector.shape_cast %59 : vector<1x256xi1> to vector<1x256xi1>
    %61 = vector.broadcast %60 : vector<1x256xi1> to vector<8x256xi1>
    %62 = vector.broadcast %cst_19 : f32 to vector<8x256xf32>
    %63 = arith.select %61, %58, %62 : vector<8x256xi1>, vector<8x256xf32>
    %64 = tpu.concatenate %25, %30, %36, %41, %8, %46, %52, %57, %63 in 0 : vector<8x256xf32>, vector<8x256xf32>, vector<8x256xf32>, vector<8x256xf32>, vector<8x256xf32>, vector<8x256xf32>, vector<8x256xf32>, vector<8x256xf32>, vector<8x256xf32> -> vector<72x256xf32>
    %c0_20 = arith.constant 0 : index
    %c0_21 = arith.constant 0 : index
    %65 = vector.load %arg3[%c0_20, %c0_21] : memref<8x72xf32, #tpu.memory_space<vmem>>, vector<8x72xf32>
    %cst_22 = arith.constant dense<0.000000e+00> : vector<8x256xf32>
    %66 = tpu.matmul %65, %64, %cst_22 {dimension_numbers = #tpu.dot_dimension_numbers<[1], [0], [0], [1], [0, 0, 1, 1], [], []>} : vector<8x72xf32>, vector<72x256xf32>, vector<8x256xf32> -> vector<8x256xf32>
    %c0_23 = arith.constant 0 : index
    %c0_24 = arith.constant 0 : index
    %67 = vector.load %arg6[%c0_23, %c0_24] : memref<8x1xf32, #tpu.memory_space<vmem>>, vector<8x1xf32>
    %68 = vector.broadcast %67 : vector<8x1xf32> to vector<8x256xf32>
    %69 = arith.addf %66, %68 : vector<8x256xf32>
    %cst_25 = arith.constant 0.000000e+00 : f32
    %70 = vector.broadcast %cst_25 : f32 to vector<8x256xf32>
    %71 = arith.maximumf %69, %70 : vector<8x256xf32>
    %72 = tpu.concatenate %71, %1 in 0 : vector<8x256xf32>, vector<4x256xf32> -> vector<12x256xf32>
    %c0_26 = arith.constant 0 : index
    %c0_27 = arith.constant 0 : index
    %73 = vector.load %arg4[%c0_26, %c0_27] : memref<32x12xf32, #tpu.memory_space<vmem>>, vector<32x12xf32>
    %cst_28 = arith.constant dense<0.000000e+00> : vector<32x256xf32>
    %74 = tpu.matmul %73, %72, %cst_28 {dimension_numbers = #tpu.dot_dimension_numbers<[1], [0], [0], [1], [0, 0, 1, 1], [], []>} : vector<32x12xf32>, vector<12x256xf32>, vector<32x256xf32> -> vector<32x256xf32>
    %c0_29 = arith.constant 0 : index
    %c0_30 = arith.constant 0 : index
    %75 = vector.load %arg7[%c0_29, %c0_30] : memref<32x1xf32, #tpu.memory_space<vmem>>, vector<32x1xf32>
    %76 = vector.broadcast %75 : vector<32x1xf32> to vector<32x256xf32>
    %77 = arith.addf %74, %76 : vector<32x256xf32>
    %cst_31 = arith.constant 0.000000e+00 : f32
    %78 = vector.broadcast %cst_31 : f32 to vector<32x256xf32>
    %79 = arith.maximumf %77, %78 : vector<32x256xf32>
    %c0_32 = arith.constant 0 : index
    %c0_33 = arith.constant 0 : index
    %c0_34 = arith.constant 0 : index
    %80 = vector.load %arg8[%c0_32, %c0_33, %c0_34] : memref<1x32x256xf32, #tpu.memory_space<vmem>>, vector<1x32x256xf32>
    %81 = vector.shape_cast %80 : vector<1x32x256xf32> to vector<32x256xf32>
    %82 = vector.shape_cast %79 : vector<32x256xf32> to vector<1x32x256xf32>
    tpu.vector_store %arg8[%c0_32, %c0_33, %c0_34], %82 {strides = array<i32>} : memref<1x32x256xf32, #tpu.memory_space<vmem>>, vector<1x32x256xf32>,
    return
  }
  func.func @transform_0(%arg0: i32) -> (i32, i32, i32) {
    %c0_i32 = arith.constant 0 : i32
    %c0_i32_0 = arith.constant 0 : i32
    %c0_i32_1 = arith.constant 0 : i32
    return %arg0, %c0_i32, %c0_i32_0 : i32, i32, i32
  }
  func.func @transform_1(%arg0: i32) -> (i32, i32) {
    %c0_i32 = arith.constant 0 : i32
    %c0_i32_0 = arith.constant 0 : i32
    %c0_i32_1 = arith.constant 0 : i32
    return %c0_i32, %c0_i32_0 : i32, i32
  }
  func.func @transform_2(%arg0: i32) -> (i32, i32) {
    %c0_i32 = arith.constant 0 : i32
    %c0_i32_0 = arith.constant 0 : i32
    %c0_i32_1 = arith.constant 0 : i32
    return %c0_i32, %c0_i32_0 : i32, i32
  }
  func.func @transform_3(%arg0: i32) -> (i32, i32) {
    %c0_i32 = arith.constant 0 : i32
    %c0_i32_0 = arith.constant 0 : i32
    %c0_i32_1 = arith.constant 0 : i32
    return %c0_i32, %c0_i32_0 : i32, i32
  }
  func.func @transform_4(%arg0: i32) -> (i32, i32) {
    %c0_i32 = arith.constant 0 : i32
    %c0_i32_0 = arith.constant 0 : i32
    %c0_i32_1 = arith.constant 0 : i32
    return %c0_i32, %c0_i32_0 : i32, i32
  }
  func.func @transform_5(%arg0: i32) -> (i32, i32) {
    %c0_i32 = arith.constant 0 : i32
    %c0_i32_0 = arith.constant 0 : i32
    %c0_i32_1 = arith.constant 0 : i32
    return %c0_i32, %c0_i32_0 : i32, i32
  }
  func.func @transform_6(%arg0: i32) -> (i32, i32) {
    %c0_i32 = arith.constant 0 : i32
    %c0_i32_0 = arith.constant 0 : i32
    %c0_i32_1 = arith.constant 0 : i32
    return %c0_i32, %c0_i32_0 : i32, i32
  }
  func.func @transform_7(%arg0: i32) -> (i32, i32, i32) {
    %c0_i32 = arith.constant 0 : i32
    %c0_i32_0 = arith.constant 0 : i32
    %c0_i32_1 = arith.constant 0 : i32
    return %arg0, %c0_i32, %c0_i32_0 : i32, i32, i32
  }
}

</mosaic_0001>

<bundles_post_ra>
// kernel: tpu_custom_call.1
= control target key start
LH: loop header
LB: loop body
LE: loop exit
PB: predicated region body
PF: predicated region fallthrough
CT: control target
= control target key end

     0   :  { %12 = vsyncpa [#allocation3], 0  ;;  %s1161_s0 = inlined_call_operand.vmem [shape: f32[2,4,256], index: 0, kind: input, shape index: {}]   ;;  %s1162_s1 = inlined_call_operand.vmem [shape: f32[8,4], index: 1, kind: input, shape index: {}]   ;;  %s1163_s2 = inlined_call_operand.vmem [shape: f32[8,72], index: 2, kind: input, shape index: {}]   ;;  %s1164_s3 = inlined_call_operand.vmem [shape: f32[32,12], index: 3, kind: input, shape index: {}]   ;;  %s1165_s4 = inlined_call_operand.vmem [shape: f32[8,1], index: 4, kind: input, shape index: {}]   ;;  %s1166_s5 = inlined_call_operand.vmem [shape: f32[8,1], index: 5, kind: input, shape index: {}]   ;;  %s1167_s6 = inlined_call_operand.vmem [shape: f32[32,1], index: 6, kind: input, shape index: {}]   ;;  %s1168_s7 = inlined_call_operand.hbm [shape: f32[2,32,256], index: 7, kind: output, shape index: {}]  }
   0x1   :  { %14 = vsyncpa [#allocation3 + $0x1], 0  ;;  %s932_s24 = smov 0   ;;  %s934_s25 = smov 0  }
   0x2   :  { %s936_s26 = smov 0   ;;  %s938_s27 = smov 0  }
   0x3 LB: > { %s953_s28 = sadd.s32 4294967295, %s880_s27   ;;  %s718_s29 = sadd.s32 4294967294, %s880_s27   ;;  %s880_s27 = sphi %s938_s27, %s1182_s27   ;;  %s876_s26 = sphi %s936_s26, %s1181_s26   ;;  %s872_s25 = sphi %s934_s25, %s1180_s25   ;;  %s868_s24 = sphi %s932_s24, %s1179_s24  }
   0x4   : > { %s957_s30 = sadd.s32 1, %s880_s27   ;;  %s179_s8 = sadd.s32 1, %s876_s26 }
   0x5   : > { %s176_s9 = ssub.s32 %s880_s27, %s957_s30  ;;  %p189_p0 = scmp.ne.s32.totalorder %s876_s26, %s872_s25 }
   0x6   : > { %p177_p1 = scmp.eq.s32.totalorder %s176_s9, 0  ;;  %p190_p2 = scmp.eq.s32.totalorder %s953_s28, 1 }
   0x7   : > { %p195_p3 = scmp.ne.s32.totalorder %s872_s25, %s868_s24  ;;  %p196_p4 = scmp.eq.s32.totalorder %s718_s29, 1 }
   0x8   : > { %s968_s10 = scalar_select %p177_p1, %s876_s26, %s179_s8  }
   0x9   : > { %p970_p5 = por %p190_p2, %p189_p0  ;;  %p974_p6 = por %p196_p4, %p195_p3 }
   0xa   : > { %p721_p7 = scmp.ge.s32.totalorder %s880_s27, 1  ;;  %p240_p8 = scmp.lt.s32.totalorder %s880_s27, 3 }
   0xc   : > { %p241_p9 = pnand %p721_p7, %p240_p8 }
   0xd   : > { %p272_p10 = scmp.lt.s32.totalorder (!%p241_p9), %s953_s28, 1  ;;  %s883_s22 = smov (!%p241_p9), 112  }
   0xe   : > { %244 = sbr.rel (%p241_p9) target bundleno = 609 (0x261), region = 48  ;;  %s884_s23 = smov (!%p241_p9), 111  }
   0xf   : > { %s885_s29 = smov (!%p241_p9), 113   ;;  %s886_s8 = smov (!%p241_p9), 127  }
  0x10   : > { %s887_s9 = smov (!%p241_p9), 1   ;;  %s888_s13 = smov (!%p241_p9), 15  }
  0x11   : > { %s889_s14 = smov (!%p241_p9), 16  }
  0x13   : > { %v279_v0 = vld [vmem:[%s1165_s4] sm:$0xff]  ;;  %v882_v1 = vmov 0   ;;  %s273_s15 = scalar_select %p272_p10, %s953_s28, 1  ;;  %vm293_vm0 = vcmask 1043456   ;;  %vm289_vm1 = vcmask 31744   ;;  %v528_v14 = vld [vmem:[%s1167_s6 + $0x18] sm:$0xff]  ;;  %v340_v15 = vlaneseq }
  0x14   : > { %815 = vset.pattern.permute.xlu0 %v882_v1  ;;  %816 = vset.pattern.permute.xlu2 %v882_v1  ;;  %v278_v3 = vld [vmem:[%s1162_s1] sm:$0xff]  ;;  %v527_v44 = vld [vmem:[%s1167_s6 + $0x10] sm:$0xff]  ;;  %v526_v61 = vld [vmem:[%s1167_s6 + $0x8] sm:$0xff] }
  0x15   : > { %282 = vperm.xlu0 %815, %v279_v0   ;;  %817 = vset.pattern.permute.xlu1 %v882_v1  ;;  %s760_s16 = sshll.u32 %s273_s15, 3  ;;  %s890_s15 = smov 17   ;;  %v525_v13 = vld [vmem:[%s1167_s6] sm:$0xff]  ;;  %v1021_v16 = vand.u32 127, %v340_v15 }
  0x16   : > { %s276_s19 = scalar_lea.vmem %s1161_s0, %s760_s16  ;;  %v466_v41 = vld [vmem:[%s1166_s5] sm:$0xff] }
  0x17   : > { %v277_v2 = vld [vmem:[%s276_s19] sm:$0xff]  ;;  %v342_v17 = vadd.s32 128, %v1021_v16  ;;  %v343_v20 = vand.u32 15, %v1021_v16  ;;  %vm454_vm4 = vcmp.lt.s32.totalorder %v1021_v16, 111  ;;  %vm441_vm7 = vcmp.lt.s32.totalorder %v1021_v16, 112 }
  0x18   : > { %286 = vst [vmem:[#allocation1] ss:$2 sm:$0xff] %v277_v2  ;;  %vm426_vm9 = vcmp.lt.s32.totalorder %v1021_v16, 113  ;;  %vm413_vm12 = vcmp.lt.s32.totalorder %v1021_v16, 127  ;;  %vm400_vm13 = vcmp.lt.s32.totalorder %v1021_v16, 1  ;;  %vm345_vm14 = vcmp.ge.s32.totalorder %v1021_v16, 16 }
  0x19   : > { %v344_v19 = vand.u32 15, %v342_v17  ;;  %vm348_vm2 = vcmp.lt.s32.totalorder %v342_v17, 240  ;;  %vm1030_vm5 = vcmp.lt.s32.totalorder %v343_v20, 15  ;;  %vm1045_vm10 = vcmp.ge.s32.totalorder %v343_v20, 1  ;;  %v465_v56 = vld [vmem:[%s1163_s2] sm:$0xff] }
  0x1a   : > { %vm385_vm15 = vcmp.lt.s32.totalorder %v1021_v16, 15 }
  0x1b   : > { %vm1025_vm3 = vcmp.lt.s32.totalorder %v344_v19, 15  ;;  %vm1040_vm8 = vcmp.ge.s32.totalorder %v344_v19, 1 }
  0x1c   : > { %vm458_vm6 = vmand %vm348_vm2, %vm1025_vm3 }
  0x1d   : > { %vm430_vm11 = vmand %vm348_vm2, %vm1040_vm8 }
  0x1f   : > { %v287_v4 = vld.sshfl [vmem:[#allocation1] sm:$0xff pattern:$0x75316420]  ;;  %v288_v5 = vld.sshfl [vmem:[#allocation1 + $0x8] sm:$0xff pattern:$0x75316420] }
  0x20   : > { %725 = vmatpush.msk.msra.mxu0 %vm293_vm0, %v287_v4  ;;  %727 = vmatpush.msk.msra.mxu1 %vm293_vm0, %v288_v5  ;;  %518 = vst [vmem:[#allocation1] ss:$2 sm:$0xff] %v277_v2  ;;  %v521_v5 = vld [vmem:[%s1164_s3] sm:$0xff] }
  0x21   : > { %726 = vmatmul.msk.f32.vlgmr.msra.gmra.mxu0 %vm289_vm1, %v278_v3  ;;  %728 = vmatmul.msk.f32.vlgmr.msra.gmra.mxu1 %vm289_vm1, %v278_v3  ;;  %vm388_vm1 = vmand %vm345_vm14, %vm1030_vm5 }
  0x27   : > { %v519_v59 = vld.sshfl [vmem:[#allocation1] sm:$0xff pattern:$0x75316420]  ;;  %v520_v60 = vld.sshfl [vmem:[#allocation1 + $0x8] sm:$0xff pattern:$0x75316420] }
  0x28   : > { %745 = vmatpush.msk.msrb.mxu0 %vm293_vm0, %v519_v59  ;;  %750 = vmatpush.msk.msrb.mxu1 %vm293_vm0, %v520_v60 }
  0x87   : > { %v283_v6 = vpop.permute.xlu0 %282 }
  0x9e   : > { %v315_v7 = vpop.f32.mrf.mxu0  ;;  %v335_v8 = vpop.f32.mrf.mxu1 }
  0x9f   : > { %v316_v9 = vadd.f32 %v315_v7, %v283_v6  ;;  %v336_v10 = vadd.f32 %v335_v8, %v283_v6  ;;  %v524_v6 = vld [vmem:[%s1164_s3 + $0x18] sm:$0xff]  ;;  %v522_v7 = vld [vmem:[%s1164_s3 + $0x8] sm:$0xff]  ;;  %v523_v8 = vld [vmem:[%s1164_s3 + $0x10] sm:$0xff] }
  0xa1   : > { %v993_v11 = vmax.f32 %v316_v9, 0.0  ;;  %v995_v12 = vmax.f32 %v336_v10, 0.0 }
  0xa3   : > { %439 = vrot.lane.b32.xlu2 %v995_v12, %s883_s22  ;;  %452 = vrot.lane.b32.xlu1 %v995_v12, %s884_s23 }
  0xa4   : > { %450 = vrot.lane.b32.xlu0 %v993_v11, %s884_s23  ;;  %s269_s23 = sand.u32 1, %s872_s25  }
  0xab   : > { %422 = vrot.lane.b32.xlu2 %v993_v11, %s885_s29  ;;  %437 = vrot.lane.b32.xlu1 %v993_v11, %s883_s22 }
  0xac   : > { %424 = vrot.lane.b32.xlu0 %v995_v12, %s885_s29  ;;  %s722_s29 = sshll.u32 %s269_s23, 6 }
  0xb3   : > { %411 = vrot.lane.b32.xlu2 %v995_v12, %s886_s8  ;;  %409 = vrot.lane.b32.xlu1 %v993_v11, %s886_s8  ;;  %s1116_s8 = scalar_lea.vmem [#allocation2], %s722_s29  ;;  %s838_s29 = scalar_lea.hbm %s1168_s7, 128 }
  0xb4   : > { %396 = vrot.lane.b32.xlu0 %v993_v11, %s887_s9  ;;  %s653_s17 = sshll.u32 %s1116_s8, 4  ;;  %s654_s17 = int_to_ptr.vmem [resolvable:$true] %s653_s17 }
  0xbb   : > { %381 = vrot.lane.b32.xlu2 %v993_v11, %s888_s13  ;;  %398 = vrot.lane.b32.xlu1 %v995_v12, %s887_s9  ;;  %s761_s9 = sshll.u32 %s953_s28, 6  ;;  %s641_s28 = scalar_lea.sflag [#allocation3], %s269_s23 }
  0xbc   : > { %383 = vrot.lane.b32.xlu0 %v995_v12, %s888_s13  ;;  %s652_s16 = scalar_lea.hbm %s1168_s7, %s761_s9 }
  0xbd   : > { %s655_s18 = sshll.u32 %s652_s16, 4  ;;  %s656_s18 = int_to_ptr.hbm [resolvable:$true] %s655_s18 }
  0xbe   : > { %s832_s19 = sshra.s32 %s656_s18, 4  ;;  %s833_s19 = int_to_ptr.hbm [resolvable:$true] %s832_s19 }
  0xbf   : > { %s834_s20 = scalar_lea.hbm %s833_s19, 64  ;;  %p839_p0 = scmp.lt.s32.totalorder %s833_s19, %s1168_s7 }
  0xc0   : > { %p835_p11 = scmp.ne.s32.totalorder %s833_s19, %s834_s20  ;;  %p840_p1 = scmp.lt.s32.totalorder %s838_s29, %s834_s20 }
  0xc2   : > { %p836_p12 = pnand %p835_p11, %p970_p5  ;;  %p841_p2 = por %p840_p1, %p839_p0 }
  0xc3   : > { %370 = vrot.lane.b32.xlu2 %v995_v12, %s889_s14  ;;  %368 = vrot.lane.b32.xlu1 %v993_v11, %s889_s14 }
  0xc4   : > { %353 = vrot.lane.b32.xlu0 %v993_v11, %s890_s15  ;;  %p837_p13 = pneg %p836_p12 }
  0xc6   : > { %p842_p3 = pnand %p841_p2, %p837_p13 }
  0xcb   : > { %355 = vrot.lane.b32.xlu1 %v995_v12, %s890_s15  ;;  %469 = vperm.xlu2 %816, %v466_v41  }
  0xcc   : > { %531 = vperm.xlu0 %815, %v525_v13  }
  0xd3   : > { %541 = vperm.xlu2 %816, %v527_v44   ;;  %536 = vperm.xlu1 %817, %v526_v61  }
  0xd4   : > { %546 = vperm.xlu0 %815, %v528_v14  }
  0xfd   : > { %v440_v18 = vpop.permute.xlu2 %439 }
 0x105   : > { %v423_v25 = vpop.permute.xlu2 %422 }
 0x10d   : > { %v412_v36 = vpop.permute.xlu2 %411 }
 0x115   : > { %v453_v22 = vpop.permute.xlu1 %452  ;;  %v382_v42 = vpop.permute.xlu2 %381 }
 0x116   : > { %v451_v24 = vpop.permute.xlu0 %450 }
 0x117   : > { %v455_v26 = vsel %vm454_vm4, %v451_v24, %v453_v22  ;;  %v456_v27 = vsel %vm454_vm4, %v453_v22, %v451_v24  ;;  %vm357_vm4 = vcmp.lt.s32.totalorder %v1021_v16, 17 }
 0x118   : > { %729 = vmatpush.msk.msra.mxu2 %vm1030_vm5, %v455_v26  ;;  %737 = vmatpush.msk.msra.mxu3 %vm458_vm6, %v456_v27  ;;  %vm549_vm6 = vcmask 97280  }
 0x11d   : > { %v438_v29 = vpop.permute.xlu1 %437  ;;  %v371_v50 = vpop.permute.xlu2 %370 }
 0x11e   : > { %v425_v30 = vpop.permute.xlu0 %424  ;;  %v442_v31 = vsel %vm441_vm7, %v438_v29, %v440_v18  ;;  %v443_v32 = vsel %vm441_vm7, %v440_v18, %v438_v29 }
 0x11f   : > { %484 = vmatpush.msra.mxu2 %v442_v31  ;;  %738 = vmatpush.msk.msra.mxu3 %vm348_vm2, %v443_v32  ;;  %v427_v34 = vsel %vm426_vm9, %v423_v25, %v425_v30  ;;  %v428_v35 = vsel %vm426_vm9, %v425_v30, %v423_v25  ;;  %vm372_vm2 = vcmp.lt.s32.totalorder %v1021_v16, 16 }
 0x121   : > { %730 = vmatpush.msk.msra.mxu2 %vm1045_vm10, %v427_v34  ;;  %739 = vmatpush.msk.msra.mxu3 %vm430_vm11, %v428_v35 }
 0x125   : > { %v410_v37 = vpop.permute.xlu1 %409  ;;  %v470_v62 = vpop.permute.xlu2 %469 }
 0x126   : > { %v397_v38 = vpop.permute.xlu0 %396  ;;  %v414_v39 = vsel %vm413_vm12, %v410_v37, %v412_v36  ;;  %v415_v40 = vsel %vm413_vm12, %v412_v36, %v410_v37 }
 0x127   : > { %731 = vmatpush.msk.msra.mxu2 %vm1030_vm5, %v414_v39  ;;  %740 = vmatpush.msk.msra.mxu3 %vm1025_vm3, %v415_v40  ;;  %vm360_vm5 = vmand %vm345_vm14, %vm1045_vm10 }
 0x129   : > { %487 = vmatpush.msra.mxu2 %v993_v11  ;;  %507 = vmatpush.msra.mxu3 %v995_v12 }
 0x12d   : > { %v399_v43 = vpop.permute.xlu1 %398  ;;  %v542_v30 = vpop.permute.xlu2 %541 }
 0x12e   : > { %v384_v45 = vpop.permute.xlu0 %383  ;;  %v402_v46 = vsel %vm400_vm13, %v399_v43, %v397_v38  ;;  %v401_v47 = vsel %vm400_vm13, %v397_v38, %v399_v43 }
 0x12f   : > { %732 = vmatpush.msk.msra.mxu2 %vm1045_vm10, %v402_v46  ;;  %741 = vmatpush.msk.msra.mxu3 %vm1040_vm8, %v401_v47  ;;  %v387_v48 = vsel %vm385_vm15, %v384_v45, %v382_v42  ;;  %v386_v49 = vsel %vm385_vm15, %v382_v42, %v384_v45 }
 0x131   : > { %733 = vmatpush.msk.msra.mxu2 %vm388_vm1, %v387_v48  ;;  %742 = vmatpush.msk.msra.mxu3 %vm1025_vm3, %v386_v49  ;;  %vm472_vm3 = vcmask 588800  }
 0x135   : > { %v369_v51 = vpop.permute.xlu1 %368 }
 0x136   : > { %v374_v52 = vsel %vm372_vm2, %v371_v50, %v369_v51  ;;  %v373_v53 = vsel %vm372_vm2, %v369_v51, %v371_v50  ;;  %v354_v54 = vpop.permute.xlu0 %353 }
 0x137   : > { %734 = vmatpush.msk.msra.mxu2 %vm345_vm14, %v374_v52  ;;  %510 = vmatpush.msra.mxu3 %v373_v53 }
 0x13d   : > { %v356_v55 = vpop.permute.xlu1 %355 }
 0x13e   : > { %v359_v57 = vsel %vm357_vm4, %v356_v55, %v354_v54  ;;  %v358_v58 = vsel %vm357_vm4, %v354_v54, %v356_v55  ;;  %v532_v9 = vpop.permute.xlu0 %531 }
 0x13f   : > { %735 = vmatpush.msk.msra.mxu2 %vm360_vm5, %v359_v57  ;;  %743 = vmatpush.msk.msra.mxu3 %vm1040_vm8, %v358_v58 }
 0x140   : > { %736 = vmatmul.msk.f32.vlgmr.msra.gmra.mxu2 %vm472_vm3, %v465_v56  ;;  %744 = vmatmul.msk.f32.vlgmr.msra.gmra.mxu3 %vm472_vm3, %v465_v56 }
 0x141   : > { %762 = vmatpush.msk.msrb.mxu2 %vm293_vm0, %v519_v59  ;;  %764 = vmatpush.msk.msrb.mxu3 %vm293_vm0, %v520_v60 }
 0x145   : > { %v537_v18 = vpop.permute.xlu1 %536 }
 0x146   : > { %v547_v16 = vpop.permute.xlu0 %546 }
 0x1c3   : > { %v493_v63 = vpop.f32.mrf.mxu2  ;;  %v513_v0 = vpop.f32.mrf.mxu3 }
 0x1c4   : > { %v494_v1 = vadd.f32 %v493_v63, %v470_v62  ;;  %v514_v2 = vadd.f32 %v513_v0, %v470_v62 }
 0x1c6   : > { %v516_v3 = vmax.f32 %v494_v1, 0.0  ;;  %v517_v4 = vmax.f32 %v514_v2, 0.0 }
 0x1c8   : > { %581 = vmatpush.msrb.mxu0 %v516_v3  ;;  %763 = vmatpush.msrb.mxu2 %v516_v3 }
 0x1c9   : > { %610 = vmatpush.msrb.mxu1 %v517_v4  ;;  %765 = vmatpush.msrb.mxu3 %v517_v4 }
 0x1ca   : > { %746 = vmatmul.msk.f32.vlgmr.msrb.gmra.mxu0 %vm549_vm6, %v521_v5  ;;  %749 = vmatmul.msk.f32.vlgmr.msrb.gmra.mxu2 %vm549_vm6, %v524_v6 }
 0x1cb   : > { %751 = vmatmul.msk.f32.vlgmr.msrb.gmra.mxu1 %vm549_vm6, %v521_v5  ;;  %754 = vmatmul.msk.f32.vlgmr.msrb.gmra.mxu3 %vm549_vm6, %v524_v6 }
 0x1d2   : > { %747 = vmatmul.msk.f32.gmra.mxu0 %vm549_vm6, %v522_v7 }
 0x1d3   : > { %752 = vmatmul.msk.f32.gmra.mxu1 %vm549_vm6, %v522_v7 }
 0x1da   : > { %748 = vmatmul.msk.f32.gmra.mxu0 %vm549_vm6, %v523_v8 }
 0x1db   : > { %753 = vmatmul.msk.f32.gmra.mxu1 %vm549_vm6, %v523_v8 }
 0x247   : > { %v583_v10 = vpop.f32.mrf.mxu0 }
 0x248   : > { %v584_v11 = vadd.f32 %v583_v10, %v532_v9  ;;  %v612_v12 = vpop.f32.mrf.mxu1 }
 0x249   : > { %v613_v13 = vadd.f32 %v612_v12, %v532_v9 }
 0x24a   : > { %v624_v14 = vmax.f32 %v584_v11, 0.0 }
 0x24b   : > { %v625_v15 = vmax.f32 %v613_v13, 0.0 }
 0x24c   : > { %632 = vst [vmem:[%s1116_s8] sm:$0xff] %v624_v14 }
 0x24d   : > { %633 = vst [vmem:[%s1116_s8 + $0x8] sm:$0xff] %v625_v15  ;;  %v592_v17 = vpop.f32.mrf.mxu2 }
 0x24e   : > { %v593_v19 = vadd.f32 %v592_v17, %v547_v16  ;;  %v621_v20 = vpop.f32.mrf.mxu3 }
 0x24f   : > { %v622_v21 = vadd.f32 %v621_v20, %v547_v16  ;;  %v586_v22 = vpop.f32.mrf.mxu0 }
 0x250   : > { %v630_v23 = vmax.f32 %v593_v19, 0.0  ;;  %v615_v24 = vpop.f32.mrf.mxu1  ;;  %v587_v25 = vadd.f32 %v586_v22, %v537_v18 }
 0x251   : > { %v631_v26 = vmax.f32 %v622_v21, 0.0  ;;  %v616_v27 = vadd.f32 %v615_v24, %v537_v18 }
 0x252   : > { %638 = vst [vmem:[%s1116_s8 + $0x30] sm:$0xff] %v630_v23  ;;  %v626_v28 = vmax.f32 %v587_v25, 0.0 }
 0x253   : > { %639 = vst [vmem:[%s1116_s8 + $0x38] sm:$0xff] %v631_v26  ;;  %v627_v29 = vmax.f32 %v616_v27, 0.0 }
 0x254   : > { %634 = vst [vmem:[%s1116_s8 + $0x10] sm:$0xff] %v626_v28 }
 0x255   : > { %635 = vst [vmem:[%s1116_s8 + $0x18] sm:$0xff] %v627_v29 }
 0x257   : > { %v589_v31 = vpop.f32.mrf.mxu0 }
 0x258   : > { %v590_v32 = vadd.f32 %v589_v31, %v542_v30  ;;  %v618_v33 = vpop.f32.mrf.mxu1 }
 0x259   : > { %v619_v34 = vadd.f32 %v618_v33, %v542_v30 }
 0x25a   : > { %v628_v35 = vmax.f32 %v590_v32, 0.0 }
 0x25b   : > { %v629_v36 = vmax.f32 %v619_v34, 0.0 }
 0x25c   : > { %636 = vst [vmem:[%s1116_s8 + $0x20] sm:$0xff] %v628_v35 }
 0x25d   : > { %637 = vst [vmem:[%s1116_s8 + $0x28] sm:$0xff] %v629_v36 }
 0x25e   : > { %845 = shalt.err (!%p842_p3)
}
 0x25f   : > { %s891_s23 = smov 256  }
 0x260   : > { %766 = dma.vmem_to_hbm [thread:$0]  (%p970_p5), %s654_s17, 1024, %s656_s18, %s641_s28, %s891_s23, %s891_s23, %s889_s14  }
 0x261 PF: > { %p772_p4 = scmp.ge.s32.totalorder %s880_s27, 2  ;;  %s670_s8 = sand.u32 1, %s868_s24  }
 0x262   : > { %s671_s15 = scalar_lea.sflag [#allocation3], %s670_s8 }
 0x263   : > { %p769_p7 = pnand %p772_p4, %p974_p6 }
 0x265   : > { %p770_p8 = pneg %p769_p7 }
 0x267   : > { %863 = dma.done.wait (%p770_p8), %s671_s15, 1024  }
 0x268   : > { %865 = vsyncadd (%p770_p8), %s671_s15, 4294966272  ;;  %p17_p9 = scmp.ge.s32.totalorder %s957_s30, 4   ;;  %s1179_s24 = smov %s872_s25 }
 0x269   : > { %s1180_s25 = smov %s876_s26  ;;  %s1181_s26 = smov %s968_s10 }
 0x26a   : > { %s1182_s27 = smov %s957_s30  ;;  %19 = sbr.rel (!%p17_p9) target bundleno = 3 (0x3), region = 83 }
 0x26f   :  { %677 = vsyncpa [#allocation3], 1 }
 0x270   :  { %679 = vsyncpa [#allocation3 + $0x1], 1 }

</bundles_post_ra>
